<compile_context>
chip_gen: v7x
topology: tpu7x:2x2x1
jax: 0.10.0
libtpu: 0.0.40
codegen_flags: <defaults>
</compile_context>

<pallas_src>
import jax
import jax.numpy as jnp
from jax.experimental import pallas as pl
from jax.experimental.pallas import tpu as pltpu

EPS = 1e-5


def bn_relu_kernel(x_ref, gamma_ref, beta_ref, o_ref):
    # x_ref: (C, L) f32 — channels on sublanes, batch*spatial on lanes.
    # gamma_ref / beta_ref: (C, 1) f32.
    x = x_ref[...]
    _, l = x.shape
    inv_n = 1.0 / l

    # Lane-axis reductions on the (idle) MXU instead of the XLU.
    ones = jnp.ones((l, 1), dtype=jnp.float32)
    s1 = jnp.dot(x, ones, preferred_element_type=jnp.float32)      # (C, 1) sum(x)
    s2 = jnp.dot(x * x, ones, preferred_element_type=jnp.float32)  # (C, 1) sum(x^2)

    # One-pass biased (training-mode) statistics on the tiny (C, 1) path.
    mean = s1 * inv_n
    var = s2 * inv_n - mean * mean
    scale = jax.lax.rsqrt(var + EPS) * gamma_ref[...]   # (C, 1)
    shift = beta_ref[...] - mean * scale                # (C, 1)  (mean folded into bias)

    # Per-element work: a single FMA + max.
    o_ref[...] = jnp.maximum(x * scale + shift, 0.0)


def batchnorm_relu(x_nchw, gamma, beta):
    """x_nchw: (N, C, H, W) float32. Returns same shape/dtype (BN train-mode + ReLU)."""
    N, C, H, W = x_nchw.shape
    L = N * H * W

    if N == 1:
        # Free contiguous reshape only — the module's case.
        x2d = x_nchw.reshape(C, L)
    else:
        # Fallback for N > 1: one XLA transpose to get per-channel rows.
        x2d = jnp.transpose(x_nchw, (1, 0, 2, 3)).reshape(C, L)

    g2d = gamma.reshape(C, 1)
    b2d = beta.reshape(C, 1)

    vmem = pltpu.MemorySpace.VMEM
    out2d = pl.pallas_call(
        bn_relu_kernel,
        out_shape=jax.ShapeDtypeStruct((C, L), x_nchw.dtype),
        # Single VMEM-resident block: no grid.  Pin everything to VMEM.
        in_specs=[pl.BlockSpec(memory_space=vmem)] * 3,
        out_specs=pl.BlockSpec(memory_space=vmem),
        # NOTE: add input_output_aliases={0: 0} when the caller no longer
        # needs x afterwards; omitted because the test below reuses x.
    )(x2d, g2d, b2d)

    if N == 1:
        return out2d.reshape(N, C, H, W)
    return jnp.transpose(out2d.reshape(C, N, H, W), (1, 0, 2, 3))


if __name__ == "__main__":
    key = jax.random.PRNGKey(0)
    kx, kg, kb = jax.random.split(key, 3)

    N, C, H, W = 1, 128, 7, 7
    x = jax.random.normal(kx, (N, C, H, W), dtype=jnp.float32)
    # Exercise the affine path with non-trivial parameters.
    gamma = 1.0 + 0.1 * jax.random.normal(kg, (C,), dtype=jnp.float32)
    beta = 0.1 * jax.random.normal(kb, (C,), dtype=jnp.float32)

    out = batchnorm_relu(x, gamma, beta)
    out = jax.block_until_ready(out)

    # Reference: training-mode BN (biased variance) + ReLU in plain JAX.
    mean = jnp.mean(x, axis=(0, 2, 3), keepdims=True)
    var = jnp.var(x, axis=(0, 2, 3), keepdims=True)
    ref = jnp.maximum(
        (x - mean) / jnp.sqrt(var + EPS) * gamma.reshape(1, C, 1, 1)
        + beta.reshape(1, C, 1, 1),
        0.0,
    )
    assert out.shape == (N, C, H, W)
    assert jnp.allclose(out, ref, atol=1e-4, rtol=1e-4)

    print("KERNEL_OK")
</pallas_src>

<mosaic_0001>
module attributes {stable_mosaic.version = 11 : i64} {
  func.func @bn_relu_kernel(%arg0: memref<128x49xf32, #tpu.memory_space<vmem>>, %arg1: memref<128x1xf32, #tpu.memory_space<vmem>>, %arg2: memref<128x1xf32, #tpu.memory_space<vmem>>, %arg3: memref<128x49xf32, #tpu.memory_space<vmem>>) attributes {dimension_semantics = [], scalar_prefetch = 0 : i64, scratch_operands = 0 : i64, tpu.core_type = #tpu.core_type<tc>} {
    %c0 = arith.constant 0 : index
    %c0_0 = arith.constant 0 : index
    %0 = vector.load %arg0[%c0, %c0_0] : memref<128x49xf32, #tpu.memory_space<vmem>>, vector<128x49xf32>
    %cst = arith.constant 1.000000e+00 : f32
    %1 = vector.broadcast %cst : f32 to vector<49x1xf32>
    %cst_1 = arith.constant dense<0.000000e+00> : vector<128x1xf32>
    %2 = tpu.matmul %0, %1, %cst_1 {dimension_numbers = #tpu.dot_dimension_numbers<[1], [0], [0], [1], [0, 0, 1, 1], [], []>} : vector<128x49xf32>, vector<49x1xf32>, vector<128x1xf32> -> vector<128x1xf32>
    %3 = arith.mulf %0, %0 : vector<128x49xf32>
    %cst_2 = arith.constant dense<0.000000e+00> : vector<128x1xf32>
    %4 = tpu.matmul %3, %1, %cst_2 {dimension_numbers = #tpu.dot_dimension_numbers<[1], [0], [0], [1], [0, 0, 1, 1], [], []>} : vector<128x49xf32>, vector<49x1xf32>, vector<128x1xf32> -> vector<128x1xf32>
    %cst_3 = arith.constant 0.0204081628 : f32
    %5 = vector.broadcast %cst_3 : f32 to vector<128x1xf32>
    %6 = arith.mulf %2, %5 : vector<128x1xf32>
    %cst_4 = arith.constant 0.0204081628 : f32
    %7 = vector.broadcast %cst_4 : f32 to vector<128x1xf32>
    %8 = arith.mulf %4, %7 : vector<128x1xf32>
    %9 = arith.mulf %6, %6 : vector<128x1xf32>
    %10 = arith.subf %8, %9 : vector<128x1xf32>
    %cst_5 = arith.constant 9.99999974E-6 : f32
    %11 = vector.broadcast %cst_5 : f32 to vector<128x1xf32>
    %12 = arith.addf %10, %11 : vector<128x1xf32>
    %13 = math.rsqrt %12 : vector<128x1xf32>
    %c0_6 = arith.constant 0 : index
    %c0_7 = arith.constant 0 : index
    %14 = vector.load %arg1[%c0_6, %c0_7] : memref<128x1xf32, #tpu.memory_space<vmem>>, vector<128x1xf32>
    %15 = arith.mulf %13, %14 : vector<128x1xf32>
    %c0_8 = arith.constant 0 : index
    %c0_9 = arith.constant 0 : index
    %16 = vector.load %arg2[%c0_8, %c0_9] : memref<128x1xf32, #tpu.memory_space<vmem>>, vector<128x1xf32>
    %17 = arith.mulf %6, %15 : vector<128x1xf32>
    %18 = arith.subf %16, %17 : vector<128x1xf32>
    %19 = vector.broadcast %15 : vector<128x1xf32> to vector<128x49xf32>
    %20 = arith.mulf %0, %19 : vector<128x49xf32>
    %21 = vector.broadcast %18 : vector<128x1xf32> to vector<128x49xf32>
    %22 = arith.addf %20, %21 : vector<128x49xf32>
    %cst_10 = arith.constant 0.000000e+00 : f32
    %23 = vector.broadcast %cst_10 : f32 to vector<128x49xf32>
    %24 = arith.maximumf %22, %23 : vector<128x49xf32>
    %c0_11 = arith.constant 0 : index
    %c0_12 = arith.constant 0 : index
    %25 = vector.load %arg3[%c0_11, %c0_12] : memref<128x49xf32, #tpu.memory_space<vmem>>, vector<128x49xf32>
    tpu.vector_store %arg3[%c0_11, %c0_12], %24 {strides = array<i32>} : memref<128x49xf32, #tpu.memory_space<vmem>>, vector<128x49xf32>,
    return
  }
}

</mosaic_0001>

<bundles_post_ra>
// kernel: tpu_custom_call.1
= control target key start
LH: loop header
LB: loop body
LE: loop exit
PB: predicated region body
PF: predicated region fallthrough
CT: control target
= control target key end

     0   :  { %v1046_v0 = vmov 1.0|1.0   ;;  %vm30_vm0 = vcmask 400384   ;;  %vm79_vm1 = vcmask 1040384   ;;  %v1047_v5 = vmov 1.0   ;;  %s1488_s0 = inlined_call_operand.vmem [shape: f32[128,49], index: 0, kind: input, shape index: {}]   ;;  %s1489_s1 = inlined_call_operand.vmem [shape: f32[128,1], index: 1, kind: input, shape index: {}]   ;;  %s1490_s2 = inlined_call_operand.vmem [shape: f32[128,1], index: 2, kind: input, shape index: {}]   ;;  %s1491_s3 = inlined_call_operand.vmem [shape: f32[128,49], index: 3, kind: output, shape index: {}]  }
   0x1   :  { %997 = vmatprep.subr.bf16.mxu0 %v1046_v0  ;;  %1003 = vmatprep.subr.bf16.mxu1 %v1046_v0  ;;  %v1072_v1 = vld [vmem:[%s1488_s0] sm:$0xff]  ;;  %v1082_v3 = vld [vmem:[%s1488_s0 + $0x8] sm:$0xff]  ;;  %v1087_v4 = vld [vmem:[%s1488_s0 + $0x10] sm:$0xff]  ;;  %v1048_v34 = vmov 0  }
   0x2   :  { %998 = vmatpush3.bf16.msra.mxu0 %v1046_v0  ;;  %1004 = vmatpush3.bf16.msra.mxu1 %v1046_v0  ;;  %v228_v2 = vmul.f32 %v1072_v1, %v1072_v1  ;;  %v229_v6 = vmul.f32 %v1082_v3, %v1082_v3  ;;  %v230_v7 = vmul.f32 %v1087_v4, %v1087_v4  ;;  %v1096_v8 = vld [vmem:[%s1488_s0 + $0x18] sm:$0xff]  ;;  %v1101_v9 = vld [vmem:[%s1488_s0 + $0x20] sm:$0xff]  ;;  %v1116_v12 = vld [vmem:[%s1488_s0 + $0x28] sm:$0xff] }
   0x3   :  { %999 = vmatprep.subr.bf16.mxu0 %v1046_v0  ;;  %1005 = vmatprep.subr.bf16.mxu1 %v1046_v0  ;;  %v231_v10 = vmul.f32 %v1096_v8, %v1096_v8  ;;  %v232_v11 = vmul.f32 %v1101_v9, %v1101_v9  ;;  %v1121_v13 = vld [vmem:[%s1488_s0 + $0x30] sm:$0xff]  ;;  %v233_v14 = vmul.f32 %v1116_v12, %v1116_v12  ;;  %v1136_v16 = vld [vmem:[%s1488_s0 + $0x38] sm:$0xff]  ;;  %v1141_v17 = vld [vmem:[%s1488_s0 + $0x40] sm:$0xff] }
   0x4   :  { %935 = vmatprep.mubr.msk.f32.mxu0 %vm30_vm0, %v1072_v1  ;;  %973 = vmatprep.mubr.msk.f32.mxu1 %vm30_vm0, %v228_v2  ;;  %v234_v15 = vmul.f32 %v1121_v13, %v1121_v13  ;;  %v235_v18 = vmul.f32 %v1136_v16, %v1136_v16  ;;  %v236_v19 = vmul.f32 %v1141_v17, %v1141_v17  ;;  %v1156_v20 = vld [vmem:[%s1488_s0 + $0x48] sm:$0xff]  ;;  %v1161_v21 = vld [vmem:[%s1488_s0 + $0x50] sm:$0xff]  ;;  %v1176_v24 = vld [vmem:[%s1488_s0 + $0x58] sm:$0xff] }
   0x5   :  { %v237_v22 = vmul.f32 %v1156_v20, %v1156_v20  ;;  %v238_v23 = vmul.f32 %v1161_v21, %v1161_v21  ;;  %v1181_v25 = vld [vmem:[%s1488_s0 + $0x60] sm:$0xff]  ;;  %v239_v26 = vmul.f32 %v1176_v24, %v1176_v24  ;;  %v1196_v28 = vld [vmem:[%s1488_s0 + $0x68] sm:$0xff]  ;;  %v1201_v29 = vld [vmem:[%s1488_s0 + $0x70] sm:$0xff]  ;;  %1012 = vset.pattern.permute.xlu0 %v1048_v34  ;;  %1013 = vset.pattern.permute.xlu1 %v1048_v34 }
   0x6   :  { %1000 = vmatpush3.bf16.msra.mxu0 %v1046_v0  ;;  %1006 = vmatpush3.bf16.msra.mxu1 %v1046_v0  ;;  %v240_v27 = vmul.f32 %v1181_v25, %v1181_v25  ;;  %v241_v30 = vmul.f32 %v1196_v28, %v1196_v28  ;;  %v242_v31 = vmul.f32 %v1201_v29, %v1201_v29  ;;  %v1216_v32 = vld [vmem:[%s1488_s0 + $0x78] sm:$0xff] }
   0x7   :  { %1001 = vmatprep.subr.bf16.mxu0 %v1046_v0  ;;  %1007 = vmatprep.subr.bf16.mxu1 %v1046_v0  ;;  %v243_v33 = vmul.f32 %v1216_v32, %v1216_v32 }
   0xa   :  { %1002 = vmatpush3.bf16.msra.mxu0 %v1046_v0  ;;  %1008 = vmatpush3.bf16.msra.mxu1 %v1046_v0 }
   0xb   :  { %933 = vmatprep.subr.msk.mxu0 %vm79_vm1, %v1047_v5  ;;  %971 = vmatprep.subr.msk.mxu1 %vm79_vm1, %v1047_v5 }
   0xe   :  { %934 = vmatpush3.msk.msra.mxu0 %vm79_vm1, %v1047_v5  ;;  %972 = vmatpush3.msk.msra.mxu1 %vm79_vm1, %v1047_v5 }
   0xf   :  { %936 = vmatmul.mubr.msk.f32.vlgmr.msra.gmra.mrb[0].mxu0 %vm30_vm0, %v1082_v3  ;;  %974 = vmatmul.mubr.msk.f32.vlgmr.msra.gmra.mrb[0].mxu1 %vm30_vm0, %v229_v6 }
  0x10   :  { %938 = vmatprep.mubr.msk.f32.mxu0 %vm30_vm0, %v1087_v4  ;;  %976 = vmatprep.mubr.msk.f32.mxu1 %vm30_vm0, %v230_v7 }
  0x13   :  { %939 = vmatmul.mubr.msk.f32.gmra.mrb[2].mxu0 %vm30_vm0, %v1096_v8  ;;  %977 = vmatmul.mubr.msk.f32.gmra.mrb[2].mxu1 %vm30_vm0, %v231_v10 }
  0x14   :  { %941 = vmatprep.mubr.msk.f32.mxu0 %vm30_vm0, %v1101_v9  ;;  %979 = vmatprep.mubr.msk.f32.mxu1 %vm30_vm0, %v232_v11 }
  0x17   :  { %942 = vmatmul.mubr.msk.f32.gmra.mrb[4].mxu0 %vm30_vm0, %v1116_v12  ;;  %980 = vmatmul.mubr.msk.f32.gmra.mrb[4].mxu1 %vm30_vm0, %v233_v14 }
  0x18   :  { %944 = vmatprep.mubr.msk.f32.mxu0 %vm30_vm0, %v1121_v13  ;;  %982 = vmatprep.mubr.msk.f32.mxu1 %vm30_vm0, %v234_v15 }
  0x1b   :  { %945 = vmatmul.mubr.msk.f32.gmra.mrb[6].mxu0 %vm30_vm0, %v1136_v16  ;;  %983 = vmatmul.mubr.msk.f32.gmra.mrb[6].mxu1 %vm30_vm0, %v235_v18 }
  0x1c   :  { %947 = vmatprep.mubr.msk.f32.mxu0 %vm30_vm0, %v1141_v17  ;;  %985 = vmatprep.mubr.msk.f32.mxu1 %vm30_vm0, %v236_v19 }
  0x1f   :  { %948 = vmatmul.mubr.msk.f32.gmra.mrb[8].mxu0 %vm30_vm0, %v1156_v20  ;;  %986 = vmatmul.mubr.msk.f32.gmra.mrb[8].mxu1 %vm30_vm0, %v237_v22 }
  0x20   :  { %950 = vmatprep.mubr.msk.f32.mxu0 %vm30_vm0, %v1161_v21  ;;  %988 = vmatprep.mubr.msk.f32.mxu1 %vm30_vm0, %v238_v23 }
  0x23   :  { %951 = vmatmul.mubr.msk.f32.gmra.mrb[10].mxu0 %vm30_vm0, %v1176_v24  ;;  %989 = vmatmul.mubr.msk.f32.gmra.mrb[10].mxu1 %vm30_vm0, %v239_v26 }
  0x24   :  { %953 = vmatprep.mubr.msk.f32.mxu0 %vm30_vm0, %v1181_v25  ;;  %991 = vmatprep.mubr.msk.f32.mxu1 %vm30_vm0, %v240_v27 }
  0x27   :  { %954 = vmatmul.mubr.msk.f32.gmra.mrb[12].mxu0 %vm30_vm0, %v1196_v28  ;;  %992 = vmatmul.mubr.msk.f32.gmra.mrb[12].mxu1 %vm30_vm0, %v241_v30 }
  0x28   :  { %956 = vmatprep.mubr.msk.f32.mxu0 %vm30_vm0, %v1201_v29  ;;  %994 = vmatprep.mubr.msk.f32.mxu1 %vm30_vm0, %v242_v31 }
  0x2b   :  { %957 = vmatmul.mubr.msk.f32.gmra.mrb[14].mxu0 %vm30_vm0, %v1216_v32  ;;  %995 = vmatmul.mubr.msk.f32.gmra.mrb[14].mxu1 %vm30_vm0, %v243_v33 }
  0xe2   :  { %v937_v35 = vpop.f32.mrb[0].mxu0  ;;  %v975_v36 = vpop.f32.mrb[0].mxu1 }
  0xe3   :  { %v1229_v37 = vmul.f32 0.020408163, %v937_v35  ;;  %v149_v38 = vpop.f32.mrb[1].mxu0  ;;  %v454_v39 = vmul.f32 0.020408163, %v975_v36  ;;  %v358_v40 = vpop.f32.mrb[1].mxu1 }
  0xe4   :  { %v1231_v41 = vmul.f32 0.020408163, %v149_v38  ;;  %v453_v42 = vmul.f32 0.020408163, %v358_v40 }
  0xe5   :  { %v470_v43 = vmul.f32 %v1229_v37, %v1229_v37 }
  0xe6   :  { %v469_v44 = vmul.f32 %v1231_v41, %v1231_v41  ;;  %v940_v45 = vpop.f32.mrb[2].mxu0  ;;  %v978_v46 = vpop.f32.mrb[2].mxu1 }
  0xe7   :  { %v486_v47 = vsub.f32 %v454_v39, %v470_v43  ;;  %v1237_v48 = vmul.f32 0.020408163, %v940_v45  ;;  %v159_v49 = vpop.f32.mrb[3].mxu0  ;;  %v456_v50 = vmul.f32 0.020408163, %v978_v46  ;;  %v368_v51 = vpop.f32.mrb[3].mxu1 }
  0xe8   :  { %v485_v52 = vsub.f32 %v453_v42, %v469_v44  ;;  %v1239_v53 = vmul.f32 0.020408163, %v159_v49  ;;  %v455_v54 = vmul.f32 0.020408163, %v368_v51  ;;  %v534_v43 = vld [vmem:[%s1489_s1 + $0x8] sm:$0xff] }
  0xe9   :  { %v502_v55 = vadd.f32 1e-05, %v486_v47  ;;  %v472_v56 = vmul.f32 %v1237_v48, %v1237_v48 }
  0xea   :  { %v501_v57 = vadd.f32 1e-05, %v485_v52  ;;  %v471_v58 = vmul.f32 %v1239_v53, %v1239_v53  ;;  %v943_v59 = vpop.f32.mrb[4].mxu0  ;;  %v981_v60 = vpop.f32.mrb[4].mxu1 }
  0xeb   :  { %1014 = vrsqrt.f32 %v502_v55  ;;  %v488_v61 = vsub.f32 %v456_v50, %v472_v56  ;;  %v1245_v62 = vmul.f32 0.020408163, %v943_v59  ;;  %v169_v63 = vpop.f32.mrb[5].mxu0  ;;  %v458_v0 = vmul.f32 0.020408163, %v981_v60  ;;  %v378_v2 = vpop.f32.mrb[5].mxu1 }
  0xec   :  { %1016 = vrsqrt.f32 %v501_v57  ;;  %v487_v5 = vsub.f32 %v455_v54, %v471_v58  ;;  %v1247_v6 = vmul.f32 0.020408163, %v169_v63  ;;  %v457_v7 = vmul.f32 0.020408163, %v378_v2  ;;  %v533_v57 = vld [vmem:[%s1489_s1] sm:$0xff]  ;;  %v536_v2 = vld [vmem:[%s1489_s1 + $0x18] sm:$0xff] }
  0xed   :  { %v504_v10 = vadd.f32 1e-05, %v488_v61  ;;  %v474_v11 = vmul.f32 %v1245_v62, %v1245_v62 }
  0xee   :  { %v503_v14 = vadd.f32 1e-05, %v487_v5  ;;  %v473_v15 = vmul.f32 %v1247_v6, %v1247_v6  ;;  %v946_v18 = vpop.f32.mrb[6].mxu0  ;;  %v984_v19 = vpop.f32.mrb[6].mxu1  ;;  %v566_v5 = vld [vmem:[%s1490_s2 + $0x8] sm:$0xff] }
  0xef   :  { %1018 = vrsqrt.f32 %v504_v10  ;;  %v490_v22 = vsub.f32 %v458_v0, %v474_v11  ;;  %v1253_v23 = vmul.f32 0.020408163, %v946_v18  ;;  %v179_v26 = vpop.f32.mrb[7].mxu0  ;;  %v460_v27 = vmul.f32 0.020408163, %v984_v19  ;;  %v388_v30 = vpop.f32.mrb[7].mxu1 }
  0xf0   :  { %v489_v31 = vsub.f32 %v457_v7, %v473_v15  ;;  %v1255_v33 = vmul.f32 0.020408163, %v179_v26  ;;  %v459_v34 = vmul.f32 0.020408163, %v388_v30  ;;  %1020 = vrsqrt.f32 %v503_v14 }
  0xf1   :  { %v506_v35 = vadd.f32 1e-05, %v490_v22  ;;  %v476_v36 = vmul.f32 %v1253_v23, %v1253_v23 }
  0xf2   :  { %v505_v38 = vadd.f32 1e-05, %v489_v31  ;;  %v475_v39 = vmul.f32 %v1255_v33, %v1255_v33  ;;  %v949_v40 = vpop.f32.mrb[8].mxu0  ;;  %v987_v42 = vpop.f32.mrb[8].mxu1 }
  0xf3   :  { %1022 = vrsqrt.f32 %v506_v35  ;;  %v492_v44 = vsub.f32 %v460_v27, %v476_v36  ;;  %v1264_v45 = vmul.f32 0.020408163, %v949_v40  ;;  %v189_v46 = vpop.f32.mrb[9].mxu0  ;;  %v462_v47 = vmul.f32 0.020408163, %v987_v42  ;;  %v398_v49 = vpop.f32.mrb[9].mxu1 }
  0xf4   :  { %1024 = vrsqrt.f32 %v505_v38  ;;  %v491_v50 = vsub.f32 %v459_v34, %v475_v39  ;;  %v1266_v51 = vmul.f32 0.020408163, %v189_v46  ;;  %v461_v52 = vmul.f32 0.020408163, %v398_v49 }
  0xf5   :  { %v1015_v54 = vpop.eup %1014  ;;  %v508_v55 = vadd.f32 1e-05, %v492_v44  ;;  %v478_v56 = vmul.f32 %v1264_v45, %v1264_v45 }
  0xf6   :  { %v1017_v58 = vpop.eup %1016  ;;  %v507_v59 = vadd.f32 1e-05, %v491_v50  ;;  %v477_v60 = vmul.f32 %v1266_v51, %v1266_v51  ;;  %v952_v61 = vpop.f32.mrb[10].mxu0  ;;  %v550_v0 = vmul.f32 %v1015_v54, %v534_v43  ;;  %v535_v43 = vld [vmem:[%s1489_s1 + $0x10] sm:$0xff] }
  0xf7   :  { %v990_v63 = vpop.f32.mrb[10].mxu1  ;;  %1026 = vrsqrt.f32 %v508_v55  ;;  %v494_v7 = vsub.f32 %v462_v47, %v478_v56  ;;  %v1281_v10 = vmul.f32 0.020408163, %v952_v61  ;;  %v199_v11 = vpop.f32.mrb[11].mxu0  ;;  %v549_v34 = vmul.f32 %v1017_v58, %v533_v57  ;;  %v565_v57 = vld [vmem:[%s1490_s2] sm:$0xff] }
  0xf8   :  { %v464_v14 = vmul.f32 0.020408163, %v990_v63  ;;  %v408_v15 = vpop.f32.mrb[11].mxu1  ;;  %1028 = vrsqrt.f32 %v507_v59  ;;  %v493_v18 = vsub.f32 %v461_v52, %v477_v60  ;;  %v1283_v19 = vmul.f32 0.020408163, %v199_v11  ;;  %620 = vperm.xlu0 %1012, %v550_v0   ;;  %v537_v58 = vld [vmem:[%s1489_s1 + $0x20] sm:$0xff] }
  0xf9   :  { %v582_v22 = vmul.f32 %v550_v0, %v1229_v37  ;;  %v1019_v26 = vpop.eup %1018  ;;  %v510_v27 = vadd.f32 1e-05, %v494_v7  ;;  %v480_v30 = vmul.f32 %v1281_v10, %v1281_v10  ;;  %v463_v31 = vmul.f32 0.020408163, %v408_v15  ;;  %v538_v37 = vld [vmem:[%s1489_s1 + $0x28] sm:$0xff] }
  0xfa   :  { %v509_v35 = vadd.f32 1e-05, %v493_v18  ;;  %v479_v36 = vmul.f32 %v1283_v19, %v1283_v19  ;;  %v552_v38 = vmul.f32 %v1019_v26, %v536_v2  ;;  %v955_v39 = vpop.f32.mrb[12].mxu0  ;;  %v993_v40 = vpop.f32.mrb[12].mxu1  ;;  %v581_v0 = vmul.f32 %v549_v34, %v1231_v41 }
  0xfb   :  { %v598_v42 = vsub.f32 %v566_v5, %v582_v22  ;;  %v1021_v44 = vpop.eup %1020  ;;  %1030 = vrsqrt.f32 %v510_v27  ;;  %v496_v46 = vsub.f32 %v464_v14, %v480_v30  ;;  %v1296_v47 = vmul.f32 0.020408163, %v955_v39  ;;  %v209_v49 = vpop.f32.mrb[13].mxu0 }
  0xfc   :  { %v466_v50 = vmul.f32 0.020408163, %v993_v40  ;;  %v418_v52 = vpop.f32.mrb[13].mxu1  ;;  %1032 = vrsqrt.f32 %v509_v35  ;;  %v495_v54 = vsub.f32 %v463_v31, %v479_v36  ;;  %615 = vperm.xlu0 %1012, %v549_v34   ;;  %630 = vperm.xlu1 %1013, %v552_v38   ;;  %v1299_v55 = vmul.f32 %v552_v38, %v1237_v48  ;;  %v539_v34 = vld [vmem:[%s1489_s1 + $0x30] sm:$0xff]  ;;  %v540_v36 = vld [vmem:[%s1489_s1 + $0x38] sm:$0xff] }
  0xfd   :  { %v1301_v56 = vmul.f32 0.020408163, %v209_v49  ;;  %v1023_v59 = vpop.eup %1022  ;;  %v512_v60 = vadd.f32 1e-05, %v496_v46  ;;  %v482_v61 = vmul.f32 %v1296_v47, %v1296_v47  ;;  %v465_v63 = vmul.f32 0.020408163, %v418_v52 }
  0xfe   :  { %v1025_v48 = vpop.eup %1024  ;;  %v511_v2 = vadd.f32 1e-05, %v495_v54  ;;  %v551_v7 = vmul.f32 %v1021_v44, %v535_v43  ;;  %v958_v11 = vpop.f32.mrb[14].mxu0  ;;  %v554_v15 = vmul.f32 %v1023_v59, %v538_v37  ;;  %v597_v22 = vsub.f32 %v565_v57, %v581_v0  ;;  %v542_v54 = vld [vmem:[%s1489_s1 + $0x48] sm:$0xff] }
  0xff   :  { %v481_v5 = vmul.f32 %v1301_v56, %v1301_v56  ;;  %v996_v14 = vpop.f32.mrb[14].mxu1  ;;  %1034 = vrsqrt.f32 %v512_v60  ;;  %v498_v18 = vsub.f32 %v466_v50, %v482_v61  ;;  %v553_v26 = vmul.f32 %v1025_v48, %v537_v58  ;;  %v219_v27 = vpop.f32.mrb[15].mxu0  ;;  %v541_v60 = vld [vmem:[%s1489_s1 + $0x40] sm:$0xff] }
 0x100   :  { %v428_v30 = vpop.f32.mrb[15].mxu1  ;;  %1036 = vrsqrt.f32 %v511_v2  ;;  %716 = vperm.xlu1 %1013, %v598_v42   ;;  %v1314_v35 = vmul.f32 0.020408163, %v958_v11  ;;  %v1316_v41 = vmul.f32 0.020408163, %v219_v27  ;;  %711 = vperm.xlu0 %1012, %v597_v22   ;;  %v583_v37 = vmul.f32 %v551_v7, %v1239_v53  ;;  %v567_v53 = vld [vmem:[%s1490_s2 + $0x10] sm:$0xff] }
 0x101   :  { %v497_v31 = vsub.f32 %v465_v63, %v481_v5  ;;  %v1027_v38 = vpop.eup %1026  ;;  %v514_v39 = vadd.f32 1e-05, %v498_v18  ;;  %v468_v40 = vmul.f32 0.020408163, %v996_v14  ;;  %v467_v43 = vmul.f32 0.020408163, %v428_v30 }
 0x102   :  { %v1029_v42 = vpop.eup %1028  ;;  %v484_v46 = vmul.f32 %v1314_v35, %v1314_v35  ;;  %v483_v49 = vmul.f32 %v1316_v41, %v1316_v41  ;;  %v556_v52 = vmul.f32 %v1027_v38, %v540_v36  ;;  %v585_v59 = vmul.f32 %v553_v26, %v1247_v6  ;;  %v568_v6 = vld [vmem:[%s1490_s2 + $0x18] sm:$0xff]  ;;  %v569_v36 = vld [vmem:[%s1490_s2 + $0x20] sm:$0xff] }
 0x103   :  { %v513_v44 = vadd.f32 1e-05, %v497_v31  ;;  %1038 = vrsqrt.f32 %v514_v39  ;;  %v555_v50 = vmul.f32 %v1029_v42, %v539_v34  ;;  %v586_v63 = vmul.f32 %v554_v15, %v1245_v62  ;;  %v544_v22 = vld [vmem:[%s1489_s1 + $0x58] sm:$0xff]  ;;  %v543_v62 = vld [vmem:[%s1489_s1 + $0x50] sm:$0xff] }
 0x104   :  { %625 = vperm.xlu1 %1013, %v551_v7   ;;  %v500_v57 = vsub.f32 %v468_v40, %v484_v46  ;;  %v499_v58 = vsub.f32 %v467_v43, %v483_v49  ;;  %635 = vperm.xlu0 %1012, %v553_v26   ;;  %v588_v48 = vmul.f32 %v556_v52, %v1253_v23 }
 0x105   :  { %1040 = vrsqrt.f32 %v513_v44  ;;  %v1031_v61 = vpop.eup %1030  ;;  %v587_v0 = vmul.f32 %v555_v50, %v1255_v33  ;;  %v599_v14 = vsub.f32 %v567_v53, %v583_v37  ;;  %v600_v30 = vsub.f32 %v568_v6, %v1299_v55  ;;  %v570_v37 = vld [vmem:[%s1490_s2 + $0x28] sm:$0xff]  ;;  %v548_v44 = vld [vmem:[%s1489_s1 + $0x78] sm:$0xff]  ;;  %v579_v6 = vld [vmem:[%s1490_s2 + $0x70] sm:$0xff] }
 0x106   :  { %v1033_v2 = vpop.eup %1032  ;;  %v516_v5 = vadd.f32 1e-05, %v500_v57  ;;  %v515_v7 = vadd.f32 1e-05, %v499_v58  ;;  %v558_v11 = vmul.f32 %v1031_v61, %v542_v54  ;;  %v601_v43 = vsub.f32 %v569_v36, %v585_v59  ;;  %v573_v61 = vld [vmem:[%s1490_s2 + $0x40] sm:$0xff] }
 0x107   :  { %v557_v18 = vmul.f32 %v1033_v2, %v541_v60  ;;  %v576_v2 = vld [vmem:[%s1490_s2 + $0x58] sm:$0xff] }
 0x108   :  { %1042 = vrsqrt.f32 %v516_v5  ;;  %640 = vperm.xlu1 %1013, %v554_v15   ;;  %v590_v23 = vmul.f32 %v558_v11, %v1264_v45  ;;  %721 = vperm.xlu0 %1012, %v599_v14   ;;  %v546_v15 = vld [vmem:[%s1489_s1 + $0x68] sm:$0xff]  ;;  %v545_v45 = vld [vmem:[%s1489_s1 + $0x60] sm:$0xff] }
 0x109   :  { %v1035_v33 = vpop.eup %1034  ;;  %1044 = vrsqrt.f32 %v515_v7  ;;  %v589_v26 = vmul.f32 %v557_v18, %v1266_v51  ;;  %v577_v7 = vld [vmem:[%s1490_s2 + $0x60] sm:$0xff]  ;;  %v578_v14 = vld [vmem:[%s1490_s2 + $0x68] sm:$0xff] }
 0x10a   :  { %v1037_v27 = vpop.eup %1036  ;;  %v560_v31 = vmul.f32 %v1035_v33, %v544_v22 }
 0x10b   :  { %v559_v34 = vmul.f32 %v1037_v27, %v543_v62  ;;  %v580_v62 = vld [vmem:[%s1490_s2 + $0x78] sm:$0xff] }
 0x10c   :  { %726 = vperm.xlu1 %1013, %v600_v30   ;;  %v592_v51 = vmul.f32 %v560_v31, %v1281_v10  ;;  %645 = vperm.xlu0 %1012, %v555_v50   ;;  %v547_v10 = vld [vmem:[%s1489_s1 + $0x70] sm:$0xff]  ;;  %v602_v50 = vsub.f32 %v570_v37, %v586_v63  ;;  %v605_v63 = vsub.f32 %v573_v61, %v589_v26 }
 0x10d   :  { %v1039_v38 = vpop.eup %1038  ;;  %v591_v55 = vmul.f32 %v559_v34, %v1283_v19 }
 0x10e   :  { %v562_v40 = vmul.f32 %v1039_v38, %v546_v15  ;;  %v608_v5 = vsub.f32 %v576_v2, %v592_v51 }
 0x10f   :  { %v1041_v39 = vpop.eup %1040 }
 0x110   :  { %v561_v42 = vmul.f32 %v1041_v39, %v545_v45  ;;  %650 = vperm.xlu1 %1013, %v556_v52   ;;  %v594_v46 = vmul.f32 %v562_v40, %v1296_v47  ;;  %731 = vperm.xlu0 %1012, %v601_v43   ;;  %v571_v52 = vld [vmem:[%s1490_s2 + $0x30] sm:$0xff] }
 0x111   :  { %v603_v59 = vsub.f32 %v571_v52, %v587_v0  ;;  %v575_v0 = vld [vmem:[%s1490_s2 + $0x50] sm:$0xff] }
 0x112   :  { %v593_v19 = vmul.f32 %v561_v42, %v1301_v56  ;;  %v1043_v49 = vpop.eup %1042  ;;  %v572_v56 = vld [vmem:[%s1490_s2 + $0x38] sm:$0xff] }
 0x113   :  { %v1045_v54 = vpop.eup %1044  ;;  %v564_v57 = vmul.f32 %v1043_v49, %v548_v44  ;;  %v604_v60 = vsub.f32 %v572_v56, %v588_v48  ;;  %v607_v48 = vsub.f32 %v575_v0, %v591_v55 }
 0x114   :  { %736 = vperm.xlu1 %1013, %v602_v50   ;;  %v563_v58 = vmul.f32 %v1045_v54, %v547_v10  ;;  %655 = vperm.xlu0 %1012, %v557_v18   ;;  %v610_v18 = vsub.f32 %v578_v14, %v594_v46 }
 0x115   :  { %v596_v47 = vmul.f32 %v564_v57, %v1314_v35  ;;  %v574_v35 = vld [vmem:[%s1490_s2 + $0x48] sm:$0xff] }
 0x116   :  { %v595_v53 = vmul.f32 %v563_v58, %v1316_v41  ;;  %v606_v41 = vsub.f32 %v574_v35, %v590_v23 }
 0x117   :  { %v612_v23 = vsub.f32 %v580_v62, %v596_v47 }
 0x118   :  { %660 = vperm.xlu1 %1013, %v558_v11   ;;  %741 = vperm.xlu0 %1012, %v603_v59   ;;  %v609_v11 = vsub.f32 %v577_v7, %v593_v19  ;;  %v611_v22 = vsub.f32 %v579_v6, %v595_v53 }
 0x11c   :  { %746 = vperm.xlu1 %1013, %v604_v60   ;;  %665 = vperm.xlu0 %1012, %v559_v34  }
 0x120   :  { %670 = vperm.xlu1 %1013, %v560_v31   ;;  %751 = vperm.xlu0 %1012, %v605_v63  }
 0x124   :  { %756 = vperm.xlu1 %1013, %v606_v41   ;;  %675 = vperm.xlu0 %1012, %v561_v42  }
 0x128   :  { %680 = vperm.xlu1 %1013, %v562_v40   ;;  %761 = vperm.xlu0 %1012, %v607_v48  }
 0x12c   :  { %766 = vperm.xlu1 %1013, %v608_v5   ;;  %685 = vperm.xlu0 %1012, %v563_v58  }
 0x130   :  { %690 = vperm.xlu1 %1013, %v564_v57   ;;  %771 = vperm.xlu0 %1012, %v609_v11  }
 0x134   :  { %776 = vperm.xlu1 %1013, %v610_v18   ;;  %781 = vperm.xlu0 %1012, %v611_v22  }
 0x138   :  { %786 = vperm.xlu1 %1013, %v612_v23  }
 0x177   :  { %v621_v33 = vpop.permute.xlu0 %620 }
 0x178   :  { %v694_v30 = vmul.f32 %v621_v33, %v1082_v3 }
 0x17b   :  { %v616_v26 = vpop.permute.xlu0 %615  ;;  %v631_v27 = vpop.permute.xlu1 %630 }
 0x17c   :  { %v693_v31 = vmul.f32 %v616_v26, %v1072_v1  ;;  %v696_v37 = vmul.f32 %v631_v27, %v1096_v8 }
 0x17f   :  { %v717_v34 = vpop.permute.xlu1 %716  ;;  %v712_v15 = vpop.permute.xlu0 %711 }
 0x180   :  { %v790_v36 = vadd.f32 %v717_v34, %v694_v30  ;;  %v789_v45 = vadd.f32 %v712_v15, %v693_v31 }
 0x182   :  { %v806_v51 = vmax.f32 %v790_v36, 0.0  ;;  %v805_v38 = vmax.f32 %v789_v45, 0.0 }
 0x183   :  { %v626_v55 = vpop.permute.xlu1 %625  ;;  %v636_v39 = vpop.permute.xlu0 %635 }
 0x184   :  { %822 = vst.msk [vmem:[%s1491_s3 + $0x8] sm:$0xff] %vm30_vm0, %v806_v51  ;;  %821 = vst.msk [vmem:[%s1491_s3] sm:$0xff] %vm30_vm0, %v805_v38  ;;  %v695_v1 = vmul.f32 %v626_v55, %v1087_v4  ;;  %v697_v49 = vmul.f32 %v636_v39, %v1101_v9 }
 0x187   :  { %v641_v3 = vpop.permute.xlu1 %640  ;;  %v722_v40 = vpop.permute.xlu0 %721 }
 0x188   :  { %v791_v43 = vadd.f32 %v722_v40, %v695_v1  ;;  %v698_v54 = vmul.f32 %v641_v3, %v1116_v12 }
 0x18a   :  { %v807_v42 = vmax.f32 %v791_v43, 0.0 }
 0x18b   :  { %v727_v44 = vpop.permute.xlu1 %726  ;;  %v646_v10 = vpop.permute.xlu0 %645 }
 0x18c   :  { %v792_v46 = vadd.f32 %v727_v44, %v696_v37  ;;  %823 = vst.msk [vmem:[%s1491_s3 + $0x10] sm:$0xff] %vm30_vm0, %v807_v42  ;;  %v699_v53 = vmul.f32 %v646_v10, %v1121_v13 }
 0x18e   :  { %v808_v19 = vmax.f32 %v792_v46, 0.0 }
 0x18f   :  { %v651_v50 = vpop.permute.xlu1 %650  ;;  %v732_v4 = vpop.permute.xlu0 %731 }
 0x190   :  { %824 = vst.msk [vmem:[%s1491_s3 + $0x18] sm:$0xff] %vm30_vm0, %v808_v19  ;;  %v793_v8 = vadd.f32 %v732_v4, %v697_v49  ;;  %v700_v60 = vmul.f32 %v651_v50, %v1136_v16 }
 0x192   :  { %v809_v57 = vmax.f32 %v793_v8, 0.0 }
 0x193   :  { %v737_v52 = vpop.permute.xlu1 %736  ;;  %v656_v47 = vpop.permute.xlu0 %655 }
 0x194   :  { %v794_v58 = vadd.f32 %v737_v52, %v698_v54  ;;  %825 = vst.msk [vmem:[%s1491_s3 + $0x20] sm:$0xff] %vm30_vm0, %v809_v57  ;;  %v701_v0 = vmul.f32 %v656_v47, %v1141_v17 }
 0x196   :  { %v810_v9 = vmax.f32 %v794_v58, 0.0 }
 0x197   :  { %v661_v59 = vpop.permute.xlu1 %660  ;;  %v742_v56 = vpop.permute.xlu0 %741 }
 0x198   :  { %826 = vst.msk [vmem:[%s1491_s3 + $0x28] sm:$0xff] %vm30_vm0, %v810_v9  ;;  %v795_v12 = vadd.f32 %v742_v56, %v699_v53  ;;  %v702_v5 = vmul.f32 %v661_v59, %v1156_v20 }
 0x19a   :  { %v811_v61 = vmax.f32 %v795_v12, 0.0 }
 0x19b   :  { %v747_v63 = vpop.permute.xlu1 %746  ;;  %v666_v41 = vpop.permute.xlu0 %665 }
 0x19c   :  { %v796_v35 = vadd.f32 %v747_v63, %v700_v60  ;;  %827 = vst.msk [vmem:[%s1491_s3 + $0x30] sm:$0xff] %vm30_vm0, %v811_v61  ;;  %v703_v18 = vmul.f32 %v666_v41, %v1161_v21 }
 0x19e   :  { %v812_v13 = vmax.f32 %v796_v35, 0.0 }
 0x19f   :  { %v671_v48 = vpop.permute.xlu1 %670  ;;  %v752_v2 = vpop.permute.xlu0 %751 }
 0x1a0   :  { %828 = vst.msk [vmem:[%s1491_s3 + $0x38] sm:$0xff] %vm30_vm0, %v812_v13  ;;  %v797_v16 = vadd.f32 %v752_v2, %v701_v0  ;;  %v704_v23 = vmul.f32 %v671_v48, %v1176_v24 }
 0x1a2   :  { %v813_v7 = vmax.f32 %v797_v16, 0.0 }
 0x1a3   :  { %v757_v11 = vpop.permute.xlu1 %756  ;;  %v676_v6 = vpop.permute.xlu0 %675 }
 0x1a4   :  { %v798_v14 = vadd.f32 %v757_v11, %v702_v5  ;;  %829 = vst.msk [vmem:[%s1491_s3 + $0x40] sm:$0xff] %vm30_vm0, %v813_v7  ;;  %v705_v31 = vmul.f32 %v676_v6, %v1181_v25 }
 0x1a6   :  { %v814_v17 = vmax.f32 %v798_v14, 0.0 }
 0x1a7   :  { %v681_v22 = vpop.permute.xlu1 %680  ;;  %v762_v62 = vpop.permute.xlu0 %761 }
 0x1a8   :  { %830 = vst.msk [vmem:[%s1491_s3 + $0x48] sm:$0xff] %vm30_vm0, %v814_v17  ;;  %v799_v20 = vadd.f32 %v762_v62, %v703_v18  ;;  %v706_v36 = vmul.f32 %v681_v22, %v1196_v28 }
 0x1aa   :  { %v815_v33 = vmax.f32 %v799_v20, 0.0 }
 0x1ab   :  { %v767_v26 = vpop.permute.xlu1 %766  ;;  %v686_v30 = vpop.permute.xlu0 %685 }
 0x1ac   :  { %v800_v27 = vadd.f32 %v767_v26, %v704_v23  ;;  %831 = vst.msk [vmem:[%s1491_s3 + $0x50] sm:$0xff] %vm30_vm0, %v815_v33  ;;  %v707_v45 = vmul.f32 %v686_v30, %v1201_v29 }
 0x1ae   :  { %v816_v21 = vmax.f32 %v800_v27, 0.0 }
 0x1af   :  { %v691_v34 = vpop.permute.xlu1 %690  ;;  %v772_v15 = vpop.permute.xlu0 %771 }
 0x1b0   :  { %832 = vst.msk [vmem:[%s1491_s3 + $0x58] sm:$0xff] %vm30_vm0, %v816_v21  ;;  %v801_v24 = vadd.f32 %v772_v15, %v705_v31  ;;  %v708_v1 = vmul.f32 %v691_v34, %v1216_v32 }
 0x1b2   :  { %v817_v51 = vmax.f32 %v801_v24, 0.0 }
 0x1b3   :  { %v777_v38 = vpop.permute.xlu1 %776  ;;  %v782_v39 = vpop.permute.xlu0 %781 }
 0x1b4   :  { %v802_v55 = vadd.f32 %v777_v38, %v706_v36  ;;  %833 = vst.msk [vmem:[%s1491_s3 + $0x60] sm:$0xff] %vm30_vm0, %v817_v51  ;;  %v803_v25 = vadd.f32 %v782_v39, %v707_v45 }
 0x1b6   :  { %v818_v3 = vmax.f32 %v802_v55, 0.0  ;;  %v819_v40 = vmax.f32 %v803_v25, 0.0 }
 0x1b7   :  { %v787_v43 = vpop.permute.xlu1 %786 }
 0x1b8   :  { %834 = vst.msk [vmem:[%s1491_s3 + $0x68] sm:$0xff] %vm30_vm0, %v818_v3  ;;  %v804_v28 = vadd.f32 %v787_v43, %v708_v1  ;;  %835 = vst.msk [vmem:[%s1491_s3 + $0x70] sm:$0xff] %vm30_vm0, %v819_v40 }
 0x1ba   :  { %v820_v29 = vmax.f32 %v804_v28, 0.0 }
 0x1bc   :  { %836 = vst.msk [vmem:[%s1491_s3 + $0x78] sm:$0xff] %vm30_vm0, %v820_v29 }

</bundles_post_ra>
